<compile_context>
chip_gen: v7x
topology: tpu7x:2x2x1
jax: 0.10.0
libtpu: 0.0.40
codegen_flags: <defaults>
</compile_context>

<pallas_src>
import functools
import math

import jax
import jax.numpy as jnp
from jax import lax
from jax.experimental import pallas as pl
from jax.experimental.pallas import tpu as pltpu


# ------------------------------ tiling helper -------------------------------

def _pick_tile(dim, target, align):
    """Largest tile <= target that is a multiple of `align` and divides `dim`;
    falls back to the full dim (always legal for a BlockSpec)."""
    if dim <= target:
        return dim
    t = (target // align) * align
    while t >= align:
        if dim % t == 0:
            return t
        t -= align
    return dim


def _gelu_exact(y):
    # exact GELU -> matches torch.nn.GELU(approximate='none')
    return 0.5 * y * (1.0 + lax.erf(y * (1.0 / math.sqrt(2.0))))


# ------------------------- fused linear (matmul) kernels ---------------------

def _linear_nk1_kernel(x_ref, w_ref, b_ref, *rest, activation, fuse_ln, fuse_res, eps):
    """Single-K-step path: y = [LN(x)] @ w + b (+GELU) (+residual), no accumulator."""
    idx = 0
    if fuse_ln:
        g_ref, beta_ref = rest[0], rest[1]
        idx = 2
    if fuse_res:
        r_ref = rest[idx]
        idx += 1
    o_ref = rest[idx]
    idx += 1
    if fuse_ln:
        xn_ref = rest[idx]          # (tm, K) bf16 scratch: normalized x, reused over j

    if fuse_ln:
        @pl.when(pl.program_id(1) == 0)
        def _():
            xf = x_ref[...].astype(jnp.float32)
            mean = jnp.mean(xf, axis=-1, keepdims=True)
            cent = xf - mean
            var = jnp.mean(cent * cent, axis=-1, keepdims=True)
            xn = cent * lax.rsqrt(var + eps) * g_ref[...] + beta_ref[...]
            xn_ref[...] = xn.astype(jnp.bfloat16)
        xop = xn_ref[...]
    else:
        xop = x_ref[...]
        if xop.dtype != jnp.bfloat16:
            xop = xop.astype(jnp.bfloat16)

    y = jnp.dot(xop, w_ref[...], preferred_element_type=jnp.float32) + b_ref[...]
    if activation == "gelu":
        y = _gelu_exact(y)
    if fuse_res:
        y = y + r_ref[...].astype(jnp.float32)
    o_ref[...] = y.astype(o_ref.dtype)


def _linear_acc_kernel(x_ref, w_ref, b_ref, *rest, activation, fuse_res, nk):
    """K-tiled path: f32 VMEM accumulator, init/finalize via pl.when."""
    idx = 0
    if fuse_res:
        r_ref = rest[0]
        idx = 1
    o_ref = rest[idx]
    acc_ref = rest[idx + 1]

    k = pl.program_id(2)

    @pl.when(k == 0)
    def _():
        acc_ref[...] = jnp.zeros_like(acc_ref)

    x = x_ref[...]
    if x.dtype != jnp.bfloat16:
        x = x.astype(jnp.bfloat16)
    acc_ref[...] += jnp.dot(x, w_ref[...], preferred_element_type=jnp.float32)

    @pl.when(k == nk - 1)
    def _():
        y = acc_ref[...] + b_ref[...]
        if activation == "gelu":
            y = _gelu_exact(y)
        if fuse_res:
            y = y + r_ref[...].astype(jnp.float32)
        o_ref[...] = y.astype(o_ref.dtype)


def fused_linear(x, w, b, *, ln_g=None, ln_b=None, residual=None,
                 activation=None, eps=1e-6, out_dtype=jnp.bfloat16,
                 tm=256, tn=512, tk=1536):
    """y = [LN(x)] @ w + b, optionally GELU, optionally + residual.  bf16 out."""
    M, K = x.shape
    N = w.shape[1]
    fuse_ln = ln_g is not None
    fuse_res = residual is not None

    tm = _pick_tile(M, tm, 8)
    tn = _pick_tile(N, tn, 128)
    tk = K if fuse_ln else _pick_tile(K, tk, 128)   # LN needs the whole row
    nk = K // tk

    if w.dtype != jnp.bfloat16:
        w = w.astype(jnp.bfloat16)
    b2 = b.reshape(1, N).astype(jnp.float32)

    if nk == 1:
        grid = (M // tm, N // tn)
        in_specs = [
            pl.BlockSpec((tm, K), lambda i, j: (i, 0)),
            pl.BlockSpec((K, tn), lambda i, j: (0, j)),
            pl.BlockSpec((1, tn), lambda i, j: (0, j)),
        ]
        inputs = [x, w, b2]
        if fuse_ln:
            in_specs += [pl.BlockSpec((1, K), lambda i, j: (0, 0)),
                         pl.BlockSpec((1, K), lambda i, j: (0, 0))]
            inputs += [ln_g.reshape(1, K).astype(jnp.float32),
                       ln_b.reshape(1, K).astype(jnp.float32)]
        if fuse_res:
            in_specs += [pl.BlockSpec((tm, tn), lambda i, j: (i, j))]
            inputs += [residual]
        scratch = [pltpu.VMEM((tm, K), jnp.bfloat16)] if fuse_ln else []
        # j must iterate sequentially per row-tile when the LN scratch is reused.
        dims = ("parallel", "arbitrary") if fuse_ln else ("parallel", "parallel")
        return pl.pallas_call(
            functools.partial(_linear_nk1_kernel, activation=activation,
                              fuse_ln=fuse_ln, fuse_res=fuse_res, eps=eps),
            grid=grid,
            in_specs=in_specs,
            out_specs=pl.BlockSpec((tm, tn), lambda i, j: (i, j)),
            out_shape=jax.ShapeDtypeStruct((M, N), out_dtype),
            scratch_shapes=scratch,
            compiler_params=pltpu.CompilerParams(dimension_semantics=dims),
        )(*inputs)

    # ---- K-tiled accumulator path (e.g. FC2 with K = 3072 at real size) ----
    grid = (M // tm, N // tn, nk)
    in_specs = [
        pl.BlockSpec((tm, tk), lambda i, j, k: (i, k)),
        pl.BlockSpec((tk, tn), lambda i, j, k: (k, j)),
        pl.BlockSpec((1, tn), lambda i, j, k: (0, j)),
    ]
    inputs = [x, w, b2]
    if fuse_res:
        in_specs += [pl.BlockSpec((tm, tn), lambda i, j, k: (i, j))]
        inputs += [residual]
    return pl.pallas_call(
        functools.partial(_linear_acc_kernel, activation=activation,
                          fuse_res=fuse_res, nk=nk),
        grid=grid,
        in_specs=in_specs,
        out_specs=pl.BlockSpec((tm, tn), lambda i, j, k: (i, j)),
        out_shape=jax.ShapeDtypeStruct((M, N), out_dtype),
        scratch_shapes=[pltpu.VMEM((tm, tn), jnp.float32)],
        compiler_params=pltpu.CompilerParams(
            dimension_semantics=("parallel", "parallel", "arbitrary")),
    )(*inputs)


# ------------------------------- layernorm ----------------------------------

def _layernorm_kernel(x_ref, g_ref, b_ref, o_ref, *, eps):
    x = x_ref[...].astype(jnp.float32)
    mean = jnp.mean(x, axis=-1, keepdims=True)
    cent = x - mean
    var = jnp.mean(cent * cent, axis=-1, keepdims=True)
    o_ref[...] = (cent * lax.rsqrt(var + eps) * g_ref[...] + b_ref[...]).astype(o_ref.dtype)


def layernorm(x, g, b, eps=1e-6, tm=256):
    """LayerNorm over the last axis, tiled over rows.  f32 out."""
    M, D = x.shape
    tm = _pick_tile(M, tm, 8)
    return pl.pallas_call(
        functools.partial(_layernorm_kernel, eps=eps),
        grid=(M // tm,),
        in_specs=[pl.BlockSpec((tm, D), lambda i: (i, 0)),
                  pl.BlockSpec((1, D), lambda i: (0, 0)),
                  pl.BlockSpec((1, D), lambda i: (0, 0))],
        out_specs=pl.BlockSpec((tm, D), lambda i: (i, 0)),
        out_shape=jax.ShapeDtypeStruct((M, D), jnp.float32),
        compiler_params=pltpu.CompilerParams(dimension_semantics=("parallel",)),
    )(x, g.reshape(1, D).astype(jnp.float32), b.reshape(1, D).astype(jnp.float32))


# -------------------------------- attention ----------------------------------

def _attention_kernel(qkv_ref, bias_ref, o_ref, *, nh, dh, scale):
    """One image per grid step.  qkv block: (1, S_pad, 3E) bf16, heads split with
    static lane slices; output assembled lane-dense as (S_pad, E)."""
    E = nh * dh
    qkv = qkv_ref[0]                                     # (S, 3E) bf16
    bias = bias_ref[...]                                 # (1, S)  f32; 0 / -1e30

    # fold the softmax scale into q once (S*E mults instead of S*S per head)
    q_all = (qkv[:, :E].astype(jnp.float32) * scale).astype(jnp.bfloat16)

    outs = []
    for h in range(nh):                                  # statically unrolled
        q_h = q_all[:, h * dh:(h + 1) * dh]              # (S, dh)
        k_h = qkv[:, E + h * dh: E + (h + 1) * dh]       # (S, dh)
        v_h = qkv[:, 2 * E + h * dh: 2 * E + (h + 1) * dh]

        s = lax.dot_general(q_h, k_h, (((1,), (1,)), ((), ())),
                            preferred_element_type=jnp.float32)   # (S, S)
        s = s + bias                                     # mask padded keys
        m = jnp.max(s, axis=-1, keepdims=True)
        p = jnp.exp(s - m)
        denom = jnp.sum(p, axis=-1, keepdims=True)
        p = p * pl.reciprocal(denom, approx=True)        # EUP slot, off the VPU path
        o_h = jnp.dot(p.astype(jnp.bfloat16), v_h,
                      preferred_element_type=jnp.float32)          # (S, dh)
        outs.append(o_h)

    o = jnp.concatenate(outs, axis=-1)                   # (S, E), lane-dense
    o_ref[0] = o.astype(o_ref.dtype)


def attention(qkv, mask_bias, *, nh, dh, scale):
    """qkv: (N, S_pad, 3E) bf16 (pure reshape of the QKV projection output).
    Returns (N, S_pad, E) bf16 in the layout the out-projection consumes."""
    N, S_pad, threeE = qkv.shape
    E = nh * dh
    assert threeE == 3 * E
    return pl.pallas_call(
        functools.partial(_attention_kernel, nh=nh, dh=dh, scale=scale),
        grid=(N,),
        in_specs=[pl.BlockSpec((1, S_pad, 3 * E), lambda n: (n, 0, 0)),
                  pl.BlockSpec((1, S_pad), lambda n: (0, 0))],
        out_specs=pl.BlockSpec((1, S_pad, E), lambda n: (n, 0, 0)),
        out_shape=jax.ShapeDtypeStruct((N, S_pad, E), jnp.bfloat16),
        compiler_params=pltpu.CompilerParams(dimension_semantics=("parallel",)),
    )(qkv, mask_bias)


# --------------------------- parameters / forward ---------------------------

def init_params(key, cfg):
    C, P, E, F, L, S = (cfg["channels"], cfg["patch"], cfg["hidden"],
                        cfg["mlp"], cfg["layers"], cfg["seq"])

    def nrm(k, shape, scale=0.02):
        return scale * jax.random.normal(k, shape, jnp.float32)

    keys = jax.random.split(key, 3 + L)
    params = {
        # conv_proj: Conv2d(C, E, kernel=P, stride=P) flattened to (C*P*P, E); bf16 weights
        "conv_w": nrm(keys[0], (C * P * P, E)).astype(jnp.bfloat16),
        "conv_b": jnp.zeros((E,), jnp.float32),
        "class_token": nrm(keys[1], (1, 1, E)),
        "pos_emb": nrm(keys[2], (1, S, E)),
        "ln_g": jnp.ones((E,), jnp.float32),
        "ln_b": jnp.zeros((E,), jnp.float32),
        "layers": [],
    }
    for l in range(L):
        lk = jax.random.split(keys[3 + l], 4)
        params["layers"].append({
            "ln1_g": jnp.ones((E,), jnp.float32),
            "ln1_b": jnp.zeros((E,), jnp.float32),
            "qkv_w": nrm(lk[0], (E, 3 * E)).astype(jnp.bfloat16),
            "qkv_b": jnp.zeros((3 * E,), jnp.float32),
            "out_w": nrm(lk[1], (E, E)).astype(jnp.bfloat16),
            "out_b": jnp.zeros((E,), jnp.float32),
            "ln2_g": jnp.ones((E,), jnp.float32),
            "ln2_b": jnp.zeros((E,), jnp.float32),
            "fc1_w": nrm(lk[2], (E, F)).astype(jnp.bfloat16),
            "fc1_b": jnp.zeros((F,), jnp.float32),
            "fc2_w": nrm(lk[3], (F, E)).astype(jnp.bfloat16),
            "fc2_b": jnp.zeros((E,), jnp.float32),
        })
    return params


def vit_forward(params, x, cfg):
    """x: (N, C, H, W) NCHW -> (N, hidden) CLS-token features."""
    C, P, E, NH = cfg["channels"], cfg["patch"], cfg["hidden"], cfg["heads"]
    N, Cx, H, W = x.shape
    assert Cx == C and H % P == 0 and W % P == 0
    nh_, nw_ = H // P, W // P
    n_patch = nh_ * nw_
    Dh = E // NH

    # _process_input: conv(kernel=stride=P) == im2col + Pallas matmul
    patches = x.reshape(N, C, nh_, P, nw_, P).transpose(0, 2, 4, 1, 3, 5)
    patches = patches.reshape(N * n_patch, C * P * P)
    emb = fused_linear(patches, params["conv_w"], params["conv_b"])   # bf16
    emb = emb.reshape(N, n_patch, E)

    # prepend class token, add pos embedding in f32 once (dropout identity in eval)
    cls = jnp.broadcast_to(params["class_token"], (N, 1, E))
    h = jnp.concatenate([cls, emb.astype(jnp.float32)], axis=1) + params["pos_emb"]
    S = n_patch + 1

    # pad sequence once to a multiple of 8 so every downstream block is tileable;
    # padded rows never influence real rows (keys are masked in attention).
    S_pad = ((S + 7) // 8) * 8
    if S_pad != S:
        h = jnp.pad(h, ((0, 0), (0, S_pad - S), (0, 0)))
    hf = h.reshape(N * S_pad, E).astype(jnp.bfloat16)                 # bf16 residual stream

    # additive key mask: 0 for real positions, -1e30 for padding
    mask_bias = jnp.where(jnp.arange(S_pad)[None, :] < S, 0.0, -1e30).astype(jnp.float32)

    scale = 1.0 / math.sqrt(Dh)
    for lp in params["layers"]:
        # --- self attention block: LN1 fused into QKV projection ---
        qkv = fused_linear(hf, lp["qkv_w"], lp["qkv_b"],
                           ln_g=lp["ln1_g"], ln_b=lp["ln1_b"])        # (N*S_pad, 3E) bf16
        a = attention(qkv.reshape(N, S_pad, 3 * E), mask_bias,
                      nh=NH, dh=Dh, scale=scale)                      # (N, S_pad, E) bf16
        # out-projection with residual add fused (reshape is free; no transposes)
        hf = fused_linear(a.reshape(N * S_pad, E), lp["out_w"], lp["out_b"], residual=hf)
        # --- MLP block: LN2 fused into FC1 (+GELU); residual fused into FC2 ---
        m = fused_linear(hf, lp["fc1_w"], lp["fc1_b"],
                         ln_g=lp["ln2_g"], ln_b=lp["ln2_b"], activation="gelu")
        hf = fused_linear(m, lp["fc2_w"], lp["fc2_b"], residual=hf)

    # final encoder LN on the CLS rows only (row-wise op => identical result)
    cls_rows = hf.reshape(N, S_pad, E)[:, 0]                          # (N, E)
    return layernorm(cls_rows, params["ln_g"], params["ln_b"])        # (N, E) f32


# ---------------------------------- main ------------------------------------

if __name__ == "__main__":
    # TODO(synk): pretrained torchvision ViT-B/16 weights are not loaded;
    # parameters use deterministic synthetic init (same structure / math).
    cfg = dict(channels=3, patch=16, hidden=32, heads=4, mlp=64, layers=2)
    N, IMG = 2, 32
    n_patch = (IMG // cfg["patch"]) ** 2
    cfg["seq"] = n_patch + 1

    key = jax.random.PRNGKey(0)
    kp, kx = jax.random.split(key)
    params = init_params(kp, cfg)
    x = jax.random.normal(kx, (N, cfg["channels"], IMG, IMG), jnp.float32)

    out = vit_forward(params, x, cfg)
    out = jax.block_until_ready(out)
    assert out.shape == (N, cfg["hidden"]), out.shape
    assert bool(jnp.all(jnp.isfinite(out)))
    print("KERNEL_OK")
</pallas_src>

<mosaic_0001>
module attributes {stable_mosaic.version = 11 : i64} {
  func.func @_linear_nk1_kernel(%arg0: i32, %arg1: i32, %arg2: memref<8x768xf32, #tpu.memory_space<vmem>>, %arg3: memref<768x32xbf16, #tpu.memory_space<vmem>>, %arg4: memref<1x32xf32, #tpu.memory_space<vmem>>, %arg5: memref<8x32xbf16, #tpu.memory_space<vmem>>) attributes {dimension_semantics = [#tpu.dimension_semantics<parallel>, #tpu.dimension_semantics<parallel>], iteration_bounds = array<i64: 1, 1>, scalar_prefetch = 0 : i64, scratch_operands = 0 : i64, tpu.core_type = #tpu.core_type<tc>, window_params = [{transform_indices = @transform_0, window_bounds = array<i64: 8, 768>}, {transform_indices = @transform_1, window_bounds = array<i64: 768, 32>}, {transform_indices = @transform_2, window_bounds = array<i64: 1, 32>}, {transform_indices = @transform_3, window_bounds = array<i64: 8, 32>}]} {
    %c0 = arith.constant 0 : index
    %c0_0 = arith.constant 0 : index
    %0 = vector.load %arg2[%c0, %c0_0] : memref<8x768xf32, #tpu.memory_space<vmem>>, vector<8x768xf32>
    %1 = arith.truncf %0 : vector<8x768xf32> to vector<8x768xbf16>
    %c0_1 = arith.constant 0 : index
    %c0_2 = arith.constant 0 : index
    %2 = vector.load %arg3[%c0_1, %c0_2] : memref<768x32xbf16, #tpu.memory_space<vmem>>, vector<768x32xbf16>
    %cst = arith.constant dense<0.000000e+00> : vector<8x32xf32>
    %3 = tpu.matmul %1, %2, %cst {dimension_numbers = #tpu.dot_dimension_numbers<[1], [0], [0], [1], [0, 0, 1, 1], [], []>} : vector<8x768xbf16>, vector<768x32xbf16>, vector<8x32xf32> -> vector<8x32xf32>
    %c0_3 = arith.constant 0 : index
    %c0_4 = arith.constant 0 : index
    %4 = vector.load %arg4[%c0_3, %c0_4] : memref<1x32xf32, #tpu.memory_space<vmem>>, vector<1x32xf32>
    %5 = vector.broadcast %4 : vector<1x32xf32> to vector<8x32xf32>
    %6 = arith.addf %3, %5 : vector<8x32xf32>
    %7 = arith.truncf %6 : vector<8x32xf32> to vector<8x32xbf16>
    %c0_5 = arith.constant 0 : index
    %c0_6 = arith.constant 0 : index
    %8 = vector.load %arg5[%c0_5, %c0_6] : memref<8x32xbf16, #tpu.memory_space<vmem>>, vector<8x32xbf16>
    tpu.vector_store %arg5[%c0_5, %c0_6], %7 {strides = array<i32>} : memref<8x32xbf16, #tpu.memory_space<vmem>>, vector<8x32xbf16>,
    return
  }
  func.func @transform_0(%arg0: i32, %arg1: i32) -> (i32, i32) {
    %c0_i32 = arith.constant 0 : i32
    %c0_i32_0 = arith.constant 0 : i32
    return %arg0, %c0_i32 : i32, i32
  }
  func.func @transform_1(%arg0: i32, %arg1: i32) -> (i32, i32) {
    %c0_i32 = arith.constant 0 : i32
    %c0_i32_0 = arith.constant 0 : i32
    return %c0_i32, %arg1 : i32, i32
  }
  func.func @transform_2(%arg0: i32, %arg1: i32) -> (i32, i32) {
    %c0_i32 = arith.constant 0 : i32
    %c0_i32_0 = arith.constant 0 : i32
    return %c0_i32, %arg1 : i32, i32
  }
  func.func @transform_3(%arg0: i32, %arg1: i32) -> (i32, i32) {
    %c0_i32 = arith.constant 0 : i32
    return %arg0, %arg1 : i32, i32
  }
}

</mosaic_0001>

<bundles_post_ra>
// kernel: tpu_custom_call.1
= control target key start
LH: loop header
LB: loop body
LE: loop exit
PB: predicated region body
PF: predicated region fallthrough
CT: control target
= control target key end

     0   :  { %s942_s0 = inlined_call_operand.vmem [shape: f32[8,768], index: 0, kind: input, shape index: {}]   ;;  %s943_s1 = inlined_call_operand.vmem [shape: bf16[768,32], index: 1, kind: input, shape index: {}]   ;;  %s944_s2 = inlined_call_operand.vmem [shape: f32[1,32], index: 2, kind: input, shape index: {}]   ;;  %s945_s3 = inlined_call_operand.hbm [shape: bf16[8,32], index: 3, kind: output, shape index: {}]  }
   0x1   :  { %v672_v0 = vld [vmem:[%s943_s1 + $0x40] sm:$0xff]   ;;  %v676_v4 = vld [vmem:[%s943_s1 + $0x48] sm:$0xff]   ;;  %v680_v8 = vld [vmem:[%s943_s1 + $0x50] sm:$0xff]  }
   0x2   :  { %v673_v1 = vld [vmem:[%s943_s1] sm:$0xff]   ;;  %605 = vmatprep.subr.bf16.mxu0 %v672_v0  ;;  %v677_v5 = vld [vmem:[%s943_s1 + $0x8] sm:$0xff]   ;;  %v681_v9 = vld [vmem:[%s943_s1 + $0x10] sm:$0xff]  }
   0x3   :  { %v674_v2 = vld [vmem:[%s943_s1 + $0xc0] sm:$0xff]   ;;  %606 = vmatpush3.bf16.msra.mxu0 %v673_v1  ;;  %v678_v6 = vld [vmem:[%s943_s1 + $0xc8] sm:$0xff]   ;;  %v682_v10 = vld [vmem:[%s943_s1 + $0xd0] sm:$0xff]  }
   0x4   :  { %v675_v3 = vld [vmem:[%s943_s1 + $0x80] sm:$0xff]   ;;  %627 = vmatprep.subr.bf16.mxu1 %v674_v2  ;;  %607 = vmatprep.subr.bf16.mxu0 %v676_v4  ;;  %v679_v7 = vld [vmem:[%s943_s1 + $0x88] sm:$0xff]   ;;  %v683_v11 = vld [vmem:[%s943_s1 + $0x90] sm:$0xff]  }
   0x5   :  { %628 = vmatpush3.bf16.msra.mxu1 %v675_v3  ;;  %v684_v12 = vld [vmem:[%s943_s1 + $0x58] sm:$0xff]   ;;  %v688_v16 = vld [vmem:[%s943_s1 + $0x60] sm:$0xff]   ;;  %v692_v20 = vld [vmem:[%s943_s1 + $0x68] sm:$0xff]  }
   0x6   :  { %629 = vmatprep.subr.bf16.mxu1 %v678_v6  ;;  %v685_v13 = vld [vmem:[%s943_s1 + $0x18] sm:$0xff]   ;;  %v689_v17 = vld [vmem:[%s943_s1 + $0x20] sm:$0xff]   ;;  %v693_v21 = vld [vmem:[%s943_s1 + $0x28] sm:$0xff]  }
   0x7   :  { %608 = vmatpush3.bf16.msra.mxu0 %v677_v5  ;;  %v686_v14 = vld [vmem:[%s943_s1 + $0xd8] sm:$0xff]   ;;  %v690_v18 = vld [vmem:[%s943_s1 + $0xe0] sm:$0xff]   ;;  %v694_v22 = vld [vmem:[%s943_s1 + $0xe8] sm:$0xff]  }
   0x8   :  { %609 = vmatprep.subr.bf16.mxu0 %v680_v8  ;;  %v687_v15 = vld [vmem:[%s943_s1 + $0x98] sm:$0xff]   ;;  %v691_v19 = vld [vmem:[%s943_s1 + $0xa0] sm:$0xff]   ;;  %v695_v23 = vld [vmem:[%s943_s1 + $0xa8] sm:$0xff]  }
   0x9   :  { %630 = vmatpush3.bf16.msra.mxu1 %v679_v7  ;;  %v696_v24 = vld [vmem:[%s943_s1 + $0x70] sm:$0xff]   ;;  %v700_v28 = vld [vmem:[%s943_s1 + $0x78] sm:$0xff]   ;;  %v17_v31 = vld [vmem:[%s942_s0 + $0x8] sm:$0xff] }
   0xa   :  { %631 = vmatprep.subr.bf16.mxu1 %v682_v10  ;;  %v697_v25 = vld [vmem:[%s943_s1 + $0x30] sm:$0xff]   ;;  %v701_v29 = vld [vmem:[%s943_s1 + $0x38] sm:$0xff]   ;;  %v23_v32 = vpack.c.bf16 %v17_v31, %v17_v31  ;;  %v16_v34 = vld [vmem:[%s942_s0] sm:$0xff] }
   0xb   :  { %610 = vmatpush3.bf16.msra.mxu0 %v681_v9  ;;  %v698_v26 = vld [vmem:[%s943_s1 + $0xf0] sm:$0xff]   ;;  %v702_v30 = vld [vmem:[%s943_s1 + $0xf8] sm:$0xff]   ;;  %v22_v35 = vpack.c.bf16 %v16_v34, %v16_v34  ;;  %v704_v36 = vld [vmem:[%s943_s1 + $0x140] sm:$0xff]  }
   0xc   :  { %611 = vmatprep.subr.bf16.mxu0 %v684_v12  ;;  %v699_v27 = vld [vmem:[%s943_s1 + $0xb0] sm:$0xff]   ;;  %v703_v33 = vld [vmem:[%s943_s1 + $0xb8] sm:$0xff]   ;;  %451 = vmatprep.mubr.bf16.mxu0 %v23_v32  ;;  %v705_v39 = vld [vmem:[%s943_s1 + $0x100] sm:$0xff]  }
   0xd   :  { %632 = vmatpush3.bf16.msra.mxu1 %v683_v11  ;;  %v19_v37 = vld [vmem:[%s942_s0 + $0x18] sm:$0xff]  ;;  %v18_v40 = vld [vmem:[%s942_s0 + $0x10] sm:$0xff]  ;;  %v706_v42 = vld [vmem:[%s943_s1 + $0x148] sm:$0xff]  }
   0xe   :  { %633 = vmatprep.subr.bf16.mxu1 %v686_v14  ;;  %v25_v38 = vpack.c.bf16 %v19_v37, %v19_v37  ;;  %v24_v41 = vpack.c.bf16 %v18_v40, %v18_v40  ;;  %v707_v43 = vld [vmem:[%s943_s1 + $0x108] sm:$0xff]   ;;  %v708_v44 = vld [vmem:[%s943_s1 + $0x150] sm:$0xff]   ;;  %v710_v46 = vld [vmem:[%s943_s1 + $0x158] sm:$0xff]  }
   0xf   :  { %612 = vmatpush3.bf16.msra.mxu0 %v685_v13  ;;  %v709_v45 = vld [vmem:[%s943_s1 + $0x110] sm:$0xff]   ;;  %v711_v47 = vld [vmem:[%s943_s1 + $0x118] sm:$0xff]   ;;  %v712_v48 = vld [vmem:[%s943_s1 + $0x160] sm:$0xff]  }
  0x10   :  { %613 = vmatprep.subr.bf16.mxu0 %v688_v16  ;;  %491 = vmatprep.mubr.bf16.mxu1 %v25_v38  ;;  %v713_v49 = vld [vmem:[%s943_s1 + $0x120] sm:$0xff]   ;;  %v714_v50 = vld [vmem:[%s943_s1 + $0x168] sm:$0xff]  }
  0x11   :  { %634 = vmatpush3.bf16.msra.mxu1 %v687_v15  ;;  %v21_v51 = vld [vmem:[%s942_s0 + $0x28] sm:$0xff] }
  0x12   :  { %635 = vmatprep.subr.bf16.mxu1 %v690_v18  ;;  %v27_v52 = vpack.c.bf16 %v21_v51, %v21_v51 }
  0x13   :  { %614 = vmatpush3.bf16.msra.mxu0 %v689_v17 }
  0x14   :  { %615 = vmatprep.subr.bf16.mxu0 %v692_v20 }
  0x15   :  { %636 = vmatpush3.bf16.msra.mxu1 %v691_v19 }
  0x16   :  { %637 = vmatprep.subr.bf16.mxu1 %v694_v22 }
  0x17   :  { %616 = vmatpush3.bf16.msra.mxu0 %v693_v21 }
  0x18   :  { %617 = vmatprep.subr.bf16.mxu0 %v696_v24 }
  0x19   :  { %638 = vmatpush3.bf16.msra.mxu1 %v695_v23 }
  0x1a   :  { %639 = vmatprep.subr.bf16.mxu1 %v698_v26 }
  0x1b   :  { %618 = vmatpush3.bf16.msra.mxu0 %v697_v25 }
  0x1c   :  { %619 = vmatprep.subr.bf16.mxu0 %v700_v28 }
  0x1d   :  { %640 = vmatpush3.bf16.msra.mxu1 %v699_v27 }
  0x1e   :  { %641 = vmatprep.subr.bf16.mxu1 %v702_v30 }
  0x1f   :  { %620 = vmatpush3.bf16.msra.mxu0 %v701_v29 }
  0x20   :  { %649 = vmatprep.subr.bf16.mxu0 %v704_v36 }
  0x21   :  { %642 = vmatpush3.bf16.msra.mxu1 %v703_v33 }
  0x22   :  { %452 = vmatmul.mubr.bf16.vlgmr.msra.gmra.mrb[0].mxu0 %v22_v35 }
  0x23   :  { %650 = vmatpush3.bf16.msra.mxu0 %v705_v39 }
  0x24   :  { %492 = vmatmul.mubr.bf16.vlgmr.msra.gmra.mrb[0].mxu1 %v24_v41  ;;  %651 = vmatprep.subr.bf16.mxu0 %v706_v42 }
  0x27   :  { %652 = vmatpush3.bf16.msra.mxu0 %v707_v43 }
  0x28   :  { %653 = vmatprep.subr.bf16.mxu0 %v708_v44 }
  0x2b   :  { %654 = vmatpush3.bf16.msra.mxu0 %v709_v45 }
  0x2c   :  { %655 = vmatprep.subr.bf16.mxu0 %v710_v46 }
  0x2f   :  { %656 = vmatpush3.bf16.msra.mxu0 %v711_v47 }
  0x30   :  { %657 = vmatprep.subr.bf16.mxu0 %v712_v48 }
  0x31   :  { %8 = vsyncpa [#allocation3], 0  ;;  %v715_v53 = vld [vmem:[%s943_s1 + $0x128] sm:$0xff]   ;;  %531 = vmatprep.mubr.bf16.mxu0 %v27_v52  ;;  %v716_v54 = vld [vmem:[%s943_s1 + $0x170] sm:$0xff]   ;;  %vm540_vm0 = vcmask 257024  }
  0x32   :  { %v717_v55 = vld [vmem:[%s943_s1 + $0x130] sm:$0xff]   ;;  %v718_v56 = vld [vmem:[%s943_s1 + $0x178] sm:$0xff]   ;;  %v20_v58 = vld [vmem:[%s942_s0 + $0x20] sm:$0xff]  ;;  %s744_s0 = smov [#allocation2]  }
  0x33   :  { %658 = vmatpush3.bf16.msra.mxu0 %v713_v49  ;;  %v719_v57 = vld [vmem:[%s943_s1 + $0x138] sm:$0xff]   ;;  %v26_v59 = vpack.c.bf16 %v20_v58, %v20_v58  ;;  %v556_v61 = vld [vmem:[%s944_s2] ss:$0 sm:$0xff]  ;;  %s548_s1 = sshll.u32 %s744_s0, 4  ;;  %s549_s1 = int_to_ptr.vmem [resolvable:$true] %s548_s1 }
  0x34   :  { %659 = vmatprep.subr.bf16.mxu0 %v714_v50  ;;  %s720_s2 = scalar_lea.vmem %s549_s1, 64  ;;  %p725_p1 = scmp.lt.s32.totalorder %s549_s1, %s549_s1 }
  0x35   :  { %p721_p0 = scmp.ne.s32.totalorder %s549_s1, %s720_s2  ;;  %p726_p2 = scmp.lt.s32.totalorder %s720_s2, %s720_s2 }
  0x37   :  { %660 = vmatpush3.bf16.msra.mxu0 %v715_v53  ;;  %p727_p3 = por %p726_p2, %p725_p1 }
  0x38   :  { %661 = vmatprep.subr.bf16.mxu0 %v716_v54 }
  0x39   :  { %p728_p4 = pnand %p727_p3, %p721_p0 }
  0x3b   :  { %662 = vmatpush3.bf16.msra.mxu0 %v717_v55 }
  0x3c   :  { %663 = vmatprep.subr.bf16.mxu0 %v718_v56 }
  0x3f   :  { %664 = vmatpush3.bf16.msra.mxu0 %v719_v57 }
  0x42   :  { %532 = vmatmul.mubr.bf16.vlgmr.msra.gmra.mrb[4].mxu0 %v26_v59 }
  0xf5   :  { %v621_v60 = vpop.f32.mrb[0].mxu0 }
  0xf6   :  { %v622_v62 = vpop.f32.mrb[1].mxu0 }
  0xf7   :  { %v623_v63 = vadd.f32 %v622_v62, %v621_v60  ;;  %v624_v0 = vpop.f32.mrb[2].mxu0  ;;  %v643_v1 = vpop.f32.mrb[0].mxu1 }
  0xf8   :  { %v625_v2 = vpop.f32.mrb[3].mxu0  ;;  %v644_v4 = vpop.f32.mrb[1].mxu1 }
  0xf9   :  { %v454_v3 = vadd.f32 %v623_v63, %v556_v61  ;;  %v645_v5 = vadd.f32 %v644_v4, %v643_v1  ;;  %v646_v6 = vpop.f32.mrb[2].mxu1 }
  0xfa   :  { %v647_v7 = vpop.f32.mrb[3].mxu1 }
  0xfb   :  { %v494_v8 = vadd.f32 %v645_v5, %v454_v3 }
 0x115   :  { %v665_v9 = vpop.f32.mrb[4].mxu0 }
 0x116   :  { %v666_v10 = vpop.f32.mrb[5].mxu0 }
 0x117   :  { %v667_v11 = vadd.f32 %v666_v10, %v665_v9  ;;  %v668_v12 = vpop.f32.mrb[6].mxu0 }
 0x118   :  { %v669_v13 = vpop.f32.mrb[7].mxu0 }
 0x119   :  { %v534_v14 = vadd.f32 %v667_v11, %v494_v8 }
 0x11b   :  { %v539_v15 = vpack.c.bf16 %v534_v14, %v534_v14 }
 0x11d   :  { %541 = vst.msk [vmem:[#allocation2] sm:$0xf] %vm540_vm0, %v539_v15 }
 0x11e   :  { %731 = shalt.err (!%p728_p4)
}
 0x11f   :  { %s732_s16 = scalar_lea.hbm %s945_s3, 64 }
 0x120   :  { %p733_p5 = scmp.ne.s32.totalorder %s945_s3, %s732_s16  ;;  %p736_p6 = scmp.lt.u32.totalorder %s732_s16, %s945_s3 }
 0x122   :  { %p738_p7 = pnand %p736_p6, %p733_p5 }
 0x124   :  { %741 = shalt.err (!%p738_p7)
}
 0x125   :  { %551 = dma.vmem_to_hbm [thread:$0]  %s549_s1, 64, %s945_s3, [#allocation3]  }
 0x126   :  { %742 = dma.done.wait [#allocation3], 64  }
 0x127   :  { %743 = vsyncadd [#allocation3], 4294967232 }
 0x128   :  { %555 = vsyncpa [#allocation3], 1 }

</bundles_post_ra>
